<compile_context>
chip_gen: v6e
topology: v6e:2x2x1
jax: 0.10.0
libtpu: 0.0.40
codegen_flags: <defaults>
</compile_context>

<pallas_src>
import functools

import jax
import jax.numpy as jnp
from jax.experimental import pallas as pl
from jax.experimental.pallas import tpu as pltpu


def _round_up(x, m):
    return ((x + m - 1) // m) * m


def _nearest_subspace_kernel(x_ref, v_ref, s_ref, pred_ref, best_ref, *, cb):
    """One grid step = one (N-tile, class-block) pair.

    x_ref:    (TM, DP)        centered test features (resident across class axis)
    v_ref:    (DP, CB*KP)     CB class bases, KP (zero-padded) components each
    s_ref:    (CB*KP, CB_PAD) block-diagonal selector (column -> class segment sum),
                              padded to >=128 lane-dense columns
    pred_ref: (TM, 1) i32     running argmax class index (output, resident)
    best_ref: (TM, 1) f32     running best (largest) captured energy (scratch)
    """
    j = pl.program_id(1)

    @pl.when(j == 0)
    def _():
        best_ref[...] = jnp.full_like(best_ref, -jnp.inf)
        pred_ref[...] = jnp.zeros_like(pred_ref)

    # (TM, CB*KP) components of x in each class basis; compute_dtype in / f32 acc.
    y = jnp.dot(x_ref[...], v_ref[...], preferred_element_type=jnp.float32)
    # Per-class captured energy ||V_i^T x||^2 via a lane-dense MXU segment-sum.
    # Cast y^2 back to the selector dtype (bf16 in production) so this matmul
    # is a single-pass MXU op; accumulate in f32.
    s = s_ref[...]
    e = jnp.dot((y * y).astype(s.dtype), s,
                preferred_element_type=jnp.float32)          # (TM, CB_PAD)

    # Within-block max + first-occurrence argmax (lowest class index on ties,
    # matching np.argmin tie-breaking of the reference).  Zero-padded classes
    # and zero-padded selector columns have zero energy; pad selector columns
    # are additionally masked out of the argmax so they can never steal a tie.
    blk_best = jnp.max(e, axis=1, keepdims=True)              # (TM, 1)
    ids = jax.lax.broadcasted_iota(jnp.int32, e.shape, 1)
    valid = ids < cb
    blk_arg = jnp.min(
        jnp.where((e == blk_best) & valid, ids, jnp.iinfo(jnp.int32).max),
        axis=1, keepdims=True) + j * cb                       # (TM, 1)

    # Single compare-and-update per (N-tile, class-block) step; strict '>'
    # keeps the earlier (lower-index) class block on exact ties.
    is_better = blk_best > best_ref[...]
    best_ref[...] = jnp.where(is_better, blk_best, best_ref[...])
    pred_ref[...] = jnp.where(is_better, blk_arg, pred_ref[...])


def nearest_subspace_predict(test_features, mean, bases, *, row_tile=None,
                             compute_dtype=jnp.bfloat16):
    """test_features: (N, D) f32; mean: (D,) f32; bases: (C, D, K) f32
    (orthonormal top-k eigvec bases; P_i = V_i V_i^T).

    Returns int32 predictions of shape (N,), matching the PyTorch forward
    (np.argmin over per-class residual L2 norms)."""
    n, d = test_features.shape
    c, d2, k = bases.shape
    assert d2 == d

    # ---- generation-aware budgets ------------------------------------------
    try:
        vmem_cap = int(pltpu.get_tpu_info().vmem_capacity_bytes)
    except Exception:
        vmem_cap = 128 << 20
    big_vmem = vmem_cap >= (96 << 20)          # v5e/v6e (128 MiB) vs v7x (64 MiB)

    # ---- blocking ------------------------------------------------------------
    # Pad the component axis to a power of two KP and process CB classes per
    # grid step so the main matmul output is lane-dense (CB*KP >= 128, up to
    # 2048 on 128-MiB-VMEM parts / 1024 on v7x).
    kp = int(pl.next_power_of_2(max(k, 1)))
    lane_cap = 2048 if big_vmem else 1024
    lane_width = max(kp, 128)
    while lane_width < lane_cap and c * kp > lane_width:
        lane_width *= 2
    cb = max(lane_width // kp, 1)
    cbkp = cb * kp
    cb_pad = _round_up(cb, 128)                # lane-dense selector output
    c_pad = _round_up(c, cb)

    # Pad D to an MXU/lane-friendly multiple: 256 matches the v6e/v7x 2x256
    # MXU (and is a 128 multiple for v5e); fall back to 128 when 256-padding
    # would waste too much K.
    d_pad = _round_up(d, 256)
    if d_pad > max(int(1.25 * d), d + 128):
        d_pad = _round_up(d, 128)

    # N tile: large enough that the re-streamed basis matrix is amortized
    # (~8-16 MiB double-buffered x tile); "parallel" grid axis.
    if row_tile is None:
        row_tile = 2048 if big_vmem else 1024
    tm = min(_round_up(n, 16), _round_up(row_tile, 16))
    n_pad = _round_up(n, tm)
    # TODO(synk): for single-N-tile serving on v7x (2 TCs), split the class
    # axis across two kernel shards and merge (best, pred) outside the kernel.

    isz = jnp.dtype(compute_dtype).itemsize
    num_cls_blocks = c_pad // cb

    # ---- operands ------------------------------------------------------------
    x = (test_features - mean[None, :]).astype(compute_dtype)
    x = jnp.zeros((n_pad, d_pad), dtype=compute_dtype).at[:n, :d].set(x)

    v = jnp.zeros((c_pad, d_pad, kp), dtype=jnp.float32).at[:c, :d, :k].set(
        bases.astype(jnp.float32))
    # (DP, C_pad*KP): class-block j occupies columns [j*CB*KP, (j+1)*CB*KP).
    vmat = jnp.transpose(v, (1, 0, 2)).reshape(d_pad, c_pad * kp).astype(
        compute_dtype)

    # Block-diagonal 0/1 selector (exact in bf16): sums the KP squared
    # components of each class; columns >= cb are zero padding (lane density).
    col_cls = jnp.arange(cbkp, dtype=jnp.int32) // kp
    smat = (col_cls[:, None] == jnp.arange(cb_pad, dtype=jnp.int32)[None, :]
            ).astype(compute_dtype)

    # ---- pipelining / VMEM budget -------------------------------------------
    # Triple-buffer the basis stream only when the x tile is small (its compute
    # cannot cover the basis DMA) and there are enough class blocks to matter.
    use_triple_buffer = (tm < 1024) and (num_cls_blocks > 2)
    vbuf = 3 if use_triple_buffer else 2

    vmem_need = (2 * tm * d_pad * isz            # x tile (double-buffered)
                 + vbuf * d_pad * cbkp * isz     # class-block basis tile
                 + 2 * cbkp * cb_pad * isz       # selector
                 + 3 * tm * 128 * 4)             # pred out tiles + best scratch
    vmem_limit = int(min(max(2 * vmem_need, 32 << 20), (vmem_cap * 3) // 4))
    vmem_limit = int(min(max(vmem_limit, vmem_need + (4 << 20)),
                         vmem_cap - (4 << 20)))

    if use_triple_buffer:
        try:
            v_spec = pl.BlockSpec((d_pad, cbkp), lambda i, j: (0, j),
                                  pipeline_mode=pl.Buffered(3))
        except TypeError:  # older pallas without pipeline_mode support
            v_spec = pl.BlockSpec((d_pad, cbkp), lambda i, j: (0, j))
    else:
        v_spec = pl.BlockSpec((d_pad, cbkp), lambda i, j: (0, j))

    # Advisory cost estimate so XLA overlaps surrounding ops with the kernel.
    flops = 2 * n_pad * d_pad * c_pad * kp + 2 * n_pad * c_pad * kp * cb_pad
    bytes_accessed = (n_pad * d_pad * isz
                      + (n_pad // tm) * d_pad * c_pad * kp * isz
                      + cbkp * cb_pad * isz
                      + n_pad * 4)
    cost = pl.CostEstimate(flops=int(flops), transcendentals=0,
                           bytes_accessed=int(bytes_accessed))

    kernel = functools.partial(_nearest_subspace_kernel, cb=cb)
    preds = pl.pallas_call(
        kernel,
        out_shape=jax.ShapeDtypeStruct((n_pad, 1), jnp.int32),
        grid_spec=pltpu.PrefetchScalarGridSpec(
            num_scalar_prefetch=0,
            grid=(n_pad // tm, num_cls_blocks),
            in_specs=[
                pl.BlockSpec((tm, d_pad), lambda i, j: (i, 0)),
                v_spec,
                pl.BlockSpec((cbkp, cb_pad), lambda i, j: (0, 0)),
            ],
            out_specs=pl.BlockSpec((tm, 1), lambda i, j: (i, 0)),
            scratch_shapes=[pltpu.VMEM((tm, 1), jnp.float32)],
        ),
        compiler_params=pltpu.CompilerParams(
            dimension_semantics=("parallel", "arbitrary"),
            vmem_limit_bytes=vmem_limit),
        cost_estimate=cost,
    )(x, vmat, smat)
    return preds[:n, 0]


def build_nearest_subspace_params(train_features, train_labels, num_classes,
                                  n_components=5):
    """Replicates NearestSubspace.__init__: per-class top-k eigvec bases of
    X_i^T X_i (P_i = V_i V_i^T) plus the global feature mean.  One-time setup
    in plain JAX (jnp.linalg.eigh), not part of the forward kernel."""
    bases = []
    for i in range(num_classes):
        xi = train_features[train_labels == i]            # concrete (host-side)
        gram = xi.T @ xi                                   # (D, D)
        _, eigvecs = jnp.linalg.eigh(gram)                 # ascending eigvals
        bases.append(eigvecs[:, -n_components:])           # top-k eigvecs (D, k)
    bases = jnp.stack(bases, axis=0)                       # (C, D, k)
    mean = jnp.mean(train_features, axis=0)                # (D,)
    return mean, bases


if __name__ == "__main__":
    key = jax.random.PRNGKey(0)
    num_classes = 4
    n_components = 5
    d = 32          # feature dimension
    n_train = 80    # training samples
    n_test = 8      # test samples

    k1, k2, k3 = jax.random.split(key, 3)
    train_features = jax.random.normal(k1, (n_train, d), dtype=jnp.float32)
    train_labels = jax.random.randint(k2, (n_train,), 0, num_classes)
    test_features = jax.random.normal(k3, (n_test, d), dtype=jnp.float32)

    mean, bases = build_nearest_subspace_params(
        train_features, train_labels, num_classes, n_components)

    # Pure-JAX f32 reference of the PyTorch forward (I - P formulation).
    projections = jnp.einsum("cdk,cek->cde", bases, bases)    # (C, D, D)
    xc = test_features - mean[None, :]
    eye = jnp.eye(d, dtype=jnp.float32)
    ref_scores = jnp.stack([
        jnp.linalg.norm((eye - projections[i]) @ xc.T, axis=0)
        for i in range(num_classes)
    ])                                                         # (C, N)
    ref_preds = jnp.argmin(ref_scores, axis=0).astype(jnp.int32)

    # f32 kernel path: must match the reference argmin exactly.
    preds_f32 = nearest_subspace_predict(
        test_features, mean, bases, compute_dtype=jnp.float32)
    preds_f32 = jax.block_until_ready(preds_f32)
    assert jnp.array_equal(preds_f32, ref_preds), (preds_f32, ref_preds)

    # bf16 kernel path (fast production default): the chosen class must be
    # (near-)optimal under the f32 reference scores (bf16 may flip exact ties;
    # users needing exact PyTorch parity should use compute_dtype=f32 or an
    # f32 re-check on near-tied rows).
    preds_bf16 = nearest_subspace_predict(
        test_features, mean, bases, compute_dtype=jnp.bfloat16)
    preds_bf16 = jax.block_until_ready(preds_bf16)
    picked = ref_scores[preds_bf16, jnp.arange(n_test)]
    best = ref_scores.min(axis=0)
    assert bool(jnp.all(picked <= best + 1e-2 * jnp.maximum(best, 1.0))), (
        picked, best)

    print("KERNEL_OK")
</pallas_src>

<mosaic_0001>
module attributes {stable_mosaic.version = 11 : i64} {
  func.func @_nearest_subspace_kernel(%arg0: i32, %arg1: i32, %arg2: memref<16x128xf32, #tpu.memory_space<vmem>>, %arg3: memref<128x128xf32, #tpu.memory_space<vmem>>, %arg4: memref<128x128xf32, #tpu.memory_space<vmem>>, %arg5: memref<16x1xi32, #tpu.memory_space<vmem>>, %arg6: memref<16x1xf32, #tpu.memory_space<vmem>>) attributes {dimension_semantics = [#tpu.dimension_semantics<parallel>, #tpu.dimension_semantics<arbitrary>], iteration_bounds = array<i64: 1, 1>, scalar_prefetch = 0 : i64, scratch_operands = 1 : i64, tpu.core_type = #tpu.core_type<tc>, window_params = [{transform_indices = @transform_0, window_bounds = array<i64: 16, 128>}, {transform_indices = @transform_1, window_bounds = array<i64: 128, 128>}, {pipeline_mode = #tpu.pipeline_mode<synchronous>, transform_indices = @transform_2, window_bounds = array<i64: 128, 128>}, {transform_indices = @transform_3, window_bounds = array<i64: 16, 1>}]} {
    %c0_i32 = arith.constant 0 : i32
    %0 = arith.cmpi eq, %arg1, %c0_i32 : i32
    %1 = arith.extui %0 : i1 to i32
    %c0_i32_0 = arith.constant 0 : i32
    %2 = arith.cmpi ne, %1, %c0_i32_0 : i32
    scf.if %2 {
      %cst_20 = arith.constant 0xFF800000 : f32
      %32 = vector.broadcast %cst_20 : f32 to vector<16x1xf32>
      %c0_21 = arith.constant 0 : index
      %c0_22 = arith.constant 0 : index
      %33 = vector.load %arg6[%c0_21, %c0_22] : memref<16x1xf32, #tpu.memory_space<vmem>>, vector<16x1xf32>
      tpu.vector_store %arg6[%c0_21, %c0_22], %32 {strides = array<i32>} : memref<16x1xf32, #tpu.memory_space<vmem>>, vector<16x1xf32>,
      %c0_i32_23 = arith.constant 0 : i32
      %34 = vector.broadcast %c0_i32_23 : i32 to vector<16x1xi32>
      %c0_24 = arith.constant 0 : index
      %c0_25 = arith.constant 0 : index
      %35 = vector.load %arg5[%c0_24, %c0_25] : memref<16x1xi32, #tpu.memory_space<vmem>>, vector<16x1xi32>
      tpu.vector_store %arg5[%c0_24, %c0_25], %34 {strides = array<i32>} : memref<16x1xi32, #tpu.memory_space<vmem>>, vector<16x1xi32>,
    } else {
    }
    %c0 = arith.constant 0 : index
    %c0_1 = arith.constant 0 : index
    %3 = vector.load %arg2[%c0, %c0_1] : memref<16x128xf32, #tpu.memory_space<vmem>>, vector<16x128xf32>
    %c0_2 = arith.constant 0 : index
    %c0_3 = arith.constant 0 : index
    %4 = vector.load %arg3[%c0_2, %c0_3] : memref<128x128xf32, #tpu.memory_space<vmem>>, vector<128x128xf32>
    %cst = arith.constant dense<0.000000e+00> : vector<16x128xf32>
    %5 = tpu.matmul %3, %4, %cst {dimension_numbers = #tpu.dot_dimension_numbers<[1], [0], [0], [1], [0, 0, 1, 1], [], []>} : vector<16x128xf32>, vector<128x128xf32>, vector<16x128xf32> -> vector<16x128xf32>
    %c0_4 = arith.constant 0 : index
    %c0_5 = arith.constant 0 : index
    %6 = vector.load %arg4[%c0_4, %c0_5] : memref<128x128xf32, #tpu.memory_space<vmem>>, vector<128x128xf32>
    %7 = arith.mulf %5, %5 : vector<16x128xf32>
    %cst_6 = arith.constant dense<0.000000e+00> : vector<16x128xf32>
    %8 = tpu.matmul %7, %6, %cst_6 {dimension_numbers = #tpu.dot_dimension_numbers<[1], [0], [0], [1], [0, 0, 1, 1], [], []>} : vector<16x128xf32>, vector<128x128xf32>, vector<16x128xf32> -> vector<16x128xf32>
    %cst_7 = arith.constant dense<0xFF800000> : vector<16xf32>
    %9 = vector.multi_reduction <maximumf>, %8, %cst_7 [1] : vector<16x128xf32> to vector<16xf32>
    %10 = vector.shape_cast %9 : vector<16xf32> to vector<16x1xf32>
    %11 = tpu.iota {dimensions = array<i32: 1>} : vector<16x128xi32>
    %c16_i32 = arith.constant 16 : i32
    %12 = vector.broadcast %c16_i32 : i32 to vector<16x128xi32>
    %13 = arith.cmpi slt, %11, %12 : vector<16x128xi32>
    %14 = vector.broadcast %10 : vector<16x1xf32> to vector<16x128xf32>
    %15 = arith.cmpf oeq, %8, %14 : vector<16x128xf32>
    %16 = arith.andi %15, %13 : vector<16x128xi1>
    %c2147483647_i32 = arith.constant 2147483647 : i32
    %17 = vector.broadcast %c2147483647_i32 : i32 to vector<16x128xi32>
    %18 = arith.select %16, %11, %17 : vector<16x128xi1>, vector<16x128xi32>
    %cst_8 = arith.constant dense<2147483647> : vector<16xi32>
    %19 = vector.multi_reduction <minsi>, %18, %cst_8 [1] : vector<16x128xi32> to vector<16xi32>
    %20 = vector.shape_cast %19 : vector<16xi32> to vector<16x1xi32>
    %c16_i32_9 = arith.constant 16 : i32
    %21 = arith.muli %arg1, %c16_i32_9 : i32
    %22 = vector.broadcast %21 : i32 to vector<16x1xi32>
    %23 = arith.addi %20, %22 : vector<16x1xi32>
    %c0_10 = arith.constant 0 : index
    %c0_11 = arith.constant 0 : index
    %24 = vector.load %arg6[%c0_10, %c0_11] : memref<16x1xf32, #tpu.memory_space<vmem>>, vector<16x1xf32>
    %25 = arith.cmpf ogt, %10, %24 : vector<16x1xf32>
    %c0_12 = arith.constant 0 : index
    %c0_13 = arith.constant 0 : index
    %26 = vector.load %arg6[%c0_12, %c0_13] : memref<16x1xf32, #tpu.memory_space<vmem>>, vector<16x1xf32>
    %27 = arith.select %25, %10, %26 : vector<16x1xi1>, vector<16x1xf32>
    %c0_14 = arith.constant 0 : index
    %c0_15 = arith.constant 0 : index
    %28 = vector.load %arg6[%c0_14, %c0_15] : memref<16x1xf32, #tpu.memory_space<vmem>>, vector<16x1xf32>
    tpu.vector_store %arg6[%c0_14, %c0_15], %27 {strides = array<i32>} : memref<16x1xf32, #tpu.memory_space<vmem>>, vector<16x1xf32>,
    %c0_16 = arith.constant 0 : index
    %c0_17 = arith.constant 0 : index
    %29 = vector.load %arg5[%c0_16, %c0_17] : memref<16x1xi32, #tpu.memory_space<vmem>>, vector<16x1xi32>
    %30 = arith.select %25, %23, %29 : vector<16x1xi1>, vector<16x1xi32>
    %c0_18 = arith.constant 0 : index
    %c0_19 = arith.constant 0 : index
    %31 = vector.load %arg5[%c0_18, %c0_19] : memref<16x1xi32, #tpu.memory_space<vmem>>, vector<16x1xi32>
    tpu.vector_store %arg5[%c0_18, %c0_19], %30 {strides = array<i32>} : memref<16x1xi32, #tpu.memory_space<vmem>>, vector<16x1xi32>,
    return
  }
  func.func @transform_0(%arg0: i32, %arg1: i32) -> (i32, i32) {
    %c0_i32 = arith.constant 0 : i32
    %c0_i32_0 = arith.constant 0 : i32
    return %arg0, %c0_i32 : i32, i32
  }
  func.func @transform_1(%arg0: i32, %arg1: i32) -> (i32, i32) {
    %c0_i32 = arith.constant 0 : i32
    %c0_i32_0 = arith.constant 0 : i32
    return %c0_i32, %arg1 : i32, i32
  }
  func.func @transform_2(%arg0: i32, %arg1: i32) -> (i32, i32) {
    %c0_i32 = arith.constant 0 : i32
    %c0_i32_0 = arith.constant 0 : i32
    %c0_i32_1 = arith.constant 0 : i32
    return %c0_i32, %c0_i32_0 : i32, i32
  }
  func.func @transform_3(%arg0: i32, %arg1: i32) -> (i32, i32) {
    %c0_i32 = arith.constant 0 : i32
    %c0_i32_0 = arith.constant 0 : i32
    return %arg0, %c0_i32 : i32, i32
  }
}

</mosaic_0001>

<bundles_post_ra>
// kernel: tpu_custom_call.1
= control target key start
LH: loop header
LB: loop body
LE: loop exit
PB: predicated region body
PF: predicated region fallthrough
CT: control target
= control target key end

     0   :  { %8 = vsyncpa [#allocation4], 0  ;;  %s561_s0 = inlined_call_operand.hbm [shape: f32[16,128], index: 0, kind: input, shape index: {}]   ;;  %s562_s1 = inlined_call_operand.hbm [shape: f32[128,128], index: 1, kind: input, shape index: {}]   ;;  %s563_s2 = inlined_call_operand.hbm [shape: f32[128,128], index: 2, kind: input, shape index: {}]   ;;  %s564_s3 = inlined_call_operand.vmem [shape: s32[16,1], index: 3, kind: output, shape index: {}]  }
   0x1   :  { %9 = vsyncpa [#allocation6], 0  ;;  %s493_s12 = smov [#allocation5]   ;;  %s494_s14 = smov [#allocation3]  }
   0x2   :  { %s27_s13 = sshll.u32 %s493_s12, 4  ;;  %s15_s15 = sshll.u32 %s494_s14, 4  ;;  %s28_s13 = int_to_ptr.vmem [resolvable:$true] %s27_s13  ;;  %s16_s15 = int_to_ptr.vmem [resolvable:$true] %s15_s15 }
   0x3   :  { %s437_s16 = scalar_lea.vmem %s28_s13, 2048  ;;  %p442_p1 = scmp.lt.s32.totalorder %s28_s13, %s28_s13 }
   0x4   :  { %p438_p0 = scmp.ne.s32.totalorder %s28_s13, %s437_s16  ;;  %p443_p2 = scmp.lt.s32.totalorder %s437_s16, %s437_s16 }
   0x6   :  { %p444_p3 = por %p443_p2, %p442_p1 }
   0x8   :  { %p445_p4 = pnand %p444_p3, %p438_p0 }
   0xa   :  { %448 = shalt.err (!%p445_p4)
}
   0xb   :  { %s495_s17 = smov 128   ;;  %s496_s18 = smov 8  }
   0xc   :  { %33 = dma.hbm_to_vmem [thread:$0]  %s562_s1, 2048, %s28_s13, [#allocation6], %s495_s17, %s495_s17, %s496_s18  }
   0xd   :  { %s457_s21 = scalar_lea.vmem %s16_s15, 256  ;;  %p462_p6 = scmp.lt.s32.totalorder %s16_s15, %s16_s15 }
   0xe   :  { %p458_p5 = scmp.ne.s32.totalorder %s16_s15, %s457_s21  ;;  %p463_p7 = scmp.lt.s32.totalorder %s457_s21, %s457_s21 }
  0x10   :  { %p464_p8 = por %p463_p7, %p462_p6 }
  0x12   :  { %p465_p9 = pnand %p464_p8, %p458_p5 }
  0x14   :  { %468 = shalt.err (!%p465_p9)
}
  0x15   :  { %21 = dma.hbm_to_vmem [thread:$0]  %s561_s0, 256, %s16_s15, [#allocation4], %s495_s17, %s495_s17, %s496_s18  }
  0x16   :  { %s497_s24 = smov [#allocation7]  }
  0x17   :  { %s39_s25 = sshll.u32 %s497_s24, 4  ;;  %s40_s25 = int_to_ptr.vmem [resolvable:$true] %s39_s25 }
  0x18   :  { %s477_s26 = scalar_lea.vmem %s40_s25, 2048  ;;  %p482_p11 = scmp.lt.s32.totalorder %s40_s25, %s40_s25 }
  0x19   :  { %p478_p10 = scmp.ne.s32.totalorder %s40_s25, %s477_s26  ;;  %p483_p12 = scmp.lt.s32.totalorder %s477_s26, %s477_s26 }
  0x1b   :  { %p484_p13 = por %p483_p12, %p482_p11 }
  0x1d   :  { %p485_p0 = pnand %p484_p13, %p478_p10 }
  0x1f   :  { %488 = shalt.err (!%p485_p0)
}
  0x20   :  { %45 = dma.hbm_to_vmem [thread:$0]  %s563_s2, 2048, %s40_s25, [#allocation6], %s495_s17, %s495_s17, %s496_s18  }
  0x21   :  { %489 = dma.done.wait [#allocation4], 256  }
  0x22   :  { %490 = vsyncadd [#allocation4], 4294967040 }
  0x23   :  { %491 = dma.done.wait [#allocation6], 4096  }
  0x24   :  { %492 = vsyncadd [#allocation6], 4294963200  ;;  %v81_v0 = vld [vmem:[#allocation5 + $0x78] sm:$0xff]  ;;  %v80_v1 = vld [vmem:[#allocation5 + $0x70] sm:$0xff]  ;;  %vm59_vm0 = vcmask 7168   ;;  %v498_v38 = vmov -inf   ;;  %v254_v41 = vlaneseq }
  0x25   :  { %352 = vmatprep.subr.mxu0 %v81_v0  ;;  %v79_v2 = vld [vmem:[#allocation5 + $0x68] sm:$0xff]  ;;  %v78_v3 = vld [vmem:[#allocation5 + $0x60] sm:$0xff]  ;;  %v64_v4 = vld [vmem:[#allocation3] sm:$0xff]  ;;  %60 = vst.msk [vmem:[#allocation2] sm:$0xff] %vm59_vm0, %v498_v38  ;;  %v499_v55 = vmov 0  }
  0x26   :  { %353 = vmatpush3.msra.mxu0 %v81_v0  ;;  %v77_v5 = vld [vmem:[#allocation5 + $0x58] sm:$0xff]  ;;  %384 = vmatprep.mubr.f32.mxu0 %v64_v4  ;;  %v171_v7 = vld [vmem:[#allocation7 + $0x70] sm:$0xff]  ;;  %v170_v9 = vld [vmem:[#allocation7 + $0x68] sm:$0xff]  ;;  %61 = vst.msk [vmem:[#allocation2 + $0x8] sm:$0xff] %vm59_vm0, %v498_v38  ;;  %v255_v42 = vand.u32 127, %v254_v41 }
  0x27   :  { %354 = vmatprep.subr.mxu0 %v80_v1  ;;  %v172_v6 = vld [vmem:[#allocation7 + $0x78] sm:$0xff]  ;;  %v76_v8 = vld [vmem:[#allocation5 + $0x50] sm:$0xff]  ;;  %v75_v10 = vld [vmem:[#allocation5 + $0x48] sm:$0xff]  ;;  %62 = vst.msk [vmem:[%s564_s3] sm:$0xff] %vm59_vm0, %v499_v55 }
  0x28   :  { %355 = vmatpush3.msra.mxu0 %v80_v1  ;;  %387 = vmatprep.subr.mxu1 %v172_v6  ;;  %v169_v11 = vld [vmem:[#allocation7 + $0x60] sm:$0xff]  ;;  %v168_v13 = vld [vmem:[#allocation7 + $0x58] sm:$0xff]  ;;  %v167_v15 = vld [vmem:[#allocation7 + $0x50] sm:$0xff]  ;;  %vm256_vm1 = vcmp.lt.s32.totalorder %v255_v42, 16  ;;  %63 = vst.msk [vmem:[%s564_s3 + $0x8] sm:$0xff] %vm59_vm0, %v499_v55 }
  0x29   :  { %356 = vmatprep.subr.mxu0 %v79_v2  ;;  %388 = vmatpush3.msra.mxu1 %v172_v6  ;;  %v74_v12 = vld [vmem:[#allocation5 + $0x40] sm:$0xff]  ;;  %v73_v14 = vld [vmem:[#allocation5 + $0x38] sm:$0xff]  ;;  %v72_v16 = vld [vmem:[#allocation5 + $0x30] sm:$0xff] }
  0x2a   :  { %357 = vmatpush3.msra.mxu0 %v79_v2  ;;  %389 = vmatprep.subr.mxu1 %v171_v7  ;;  %v166_v17 = vld [vmem:[#allocation7 + $0x48] sm:$0xff]  ;;  %v165_v19 = vld [vmem:[#allocation7 + $0x40] sm:$0xff]  ;;  %v164_v21 = vld [vmem:[#allocation7 + $0x38] sm:$0xff] }
  0x2b   :  { %358 = vmatprep.subr.mxu0 %v78_v3  ;;  %390 = vmatpush3.msra.mxu1 %v171_v7  ;;  %v71_v18 = vld [vmem:[#allocation5 + $0x28] sm:$0xff]  ;;  %v70_v20 = vld [vmem:[#allocation5 + $0x20] sm:$0xff]  ;;  %v69_v22 = vld [vmem:[#allocation5 + $0x18] sm:$0xff] }
  0x2c   :  { %359 = vmatpush3.msra.mxu0 %v78_v3  ;;  %391 = vmatprep.subr.mxu1 %v170_v9  ;;  %v163_v23 = vld [vmem:[#allocation7 + $0x30] sm:$0xff]  ;;  %v162_v25 = vld [vmem:[#allocation7 + $0x28] sm:$0xff]  ;;  %v161_v27 = vld [vmem:[#allocation7 + $0x20] sm:$0xff] }
  0x2d   :  { %360 = vmatprep.subr.mxu0 %v77_v5  ;;  %392 = vmatpush3.msra.mxu1 %v170_v9  ;;  %v68_v24 = vld [vmem:[#allocation5 + $0x10] sm:$0xff]  ;;  %v67_v26 = vld [vmem:[#allocation5 + $0x8] sm:$0xff]  ;;  %v66_v28 = vld [vmem:[#allocation5] sm:$0xff] }
  0x2e   :  { %361 = vmatpush3.msra.mxu0 %v77_v5  ;;  %393 = vmatprep.subr.mxu1 %v169_v11  ;;  %v160_v29 = vld [vmem:[#allocation7 + $0x18] sm:$0xff]  ;;  %v159_v31 = vld [vmem:[#allocation7 + $0x10] sm:$0xff]  ;;  %v158_v32 = vld [vmem:[#allocation7 + $0x8] sm:$0xff] }
  0x2f   :  { %362 = vmatprep.subr.mxu0 %v76_v8  ;;  %394 = vmatpush3.msra.mxu1 %v169_v11  ;;  %v65_v30 = vld [vmem:[#allocation3 + $0x8] sm:$0xff]  ;;  %v157_v33 = vld [vmem:[#allocation7] sm:$0xff]  ;;  %v296_v46 = vld [vmem:[#allocation2 + $0x8] sm:$0xff] }
  0x30   :  { %363 = vmatpush3.msra.mxu0 %v76_v8  ;;  %395 = vmatprep.subr.mxu1 %v168_v13  ;;  %v295_v43 = vld [vmem:[#allocation2] sm:$0xff]  ;;  %v305_v11 = vld [vmem:[%s564_s3 + $0x8] sm:$0xff] }
  0x31   :  { %364 = vmatprep.subr.mxu0 %v75_v10  ;;  %396 = vmatpush3.msra.mxu1 %v168_v13  ;;  %v304_v5 = vld [vmem:[%s564_s3] sm:$0xff] }
  0x32   :  { %365 = vmatpush3.msra.mxu0 %v75_v10  ;;  %397 = vmatprep.subr.mxu1 %v167_v15 }
  0x33   :  { %366 = vmatprep.subr.mxu0 %v74_v12  ;;  %398 = vmatpush3.msra.mxu1 %v167_v15 }
  0x34   :  { %367 = vmatpush3.msra.mxu0 %v74_v12  ;;  %399 = vmatprep.subr.mxu1 %v166_v17 }
  0x35   :  { %368 = vmatprep.subr.mxu0 %v73_v14  ;;  %400 = vmatpush3.msra.mxu1 %v166_v17 }
  0x36   :  { %369 = vmatpush3.msra.mxu0 %v73_v14  ;;  %401 = vmatprep.subr.mxu1 %v165_v19 }
  0x37   :  { %370 = vmatprep.subr.mxu0 %v72_v16  ;;  %402 = vmatpush3.msra.mxu1 %v165_v19 }
  0x38   :  { %371 = vmatpush3.msra.mxu0 %v72_v16  ;;  %403 = vmatprep.subr.mxu1 %v164_v21 }
  0x39   :  { %372 = vmatprep.subr.mxu0 %v71_v18  ;;  %404 = vmatpush3.msra.mxu1 %v164_v21 }
  0x3a   :  { %373 = vmatpush3.msra.mxu0 %v71_v18  ;;  %405 = vmatprep.subr.mxu1 %v163_v23 }
  0x3b   :  { %374 = vmatprep.subr.mxu0 %v70_v20  ;;  %406 = vmatpush3.msra.mxu1 %v163_v23 }
  0x3c   :  { %375 = vmatpush3.msra.mxu0 %v70_v20  ;;  %407 = vmatprep.subr.mxu1 %v162_v25 }
  0x3d   :  { %376 = vmatprep.subr.mxu0 %v69_v22  ;;  %408 = vmatpush3.msra.mxu1 %v162_v25 }
  0x3e   :  { %377 = vmatpush3.msra.mxu0 %v69_v22  ;;  %409 = vmatprep.subr.mxu1 %v161_v27 }
  0x3f   :  { %378 = vmatprep.subr.mxu0 %v68_v24  ;;  %410 = vmatpush3.msra.mxu1 %v161_v27 }
  0x40   :  { %379 = vmatpush3.msra.mxu0 %v68_v24  ;;  %411 = vmatprep.subr.mxu1 %v160_v29 }
  0x41   :  { %380 = vmatprep.subr.mxu0 %v67_v26  ;;  %412 = vmatpush3.msra.mxu1 %v160_v29 }
  0x42   :  { %381 = vmatpush3.msra.mxu0 %v67_v26  ;;  %413 = vmatprep.subr.mxu1 %v159_v31 }
  0x43   :  { %382 = vmatprep.subr.mxu0 %v66_v28  ;;  %414 = vmatpush3.msra.mxu1 %v159_v31 }
  0x44   :  { %383 = vmatpush3.msra.mxu0 %v66_v28  ;;  %415 = vmatprep.subr.mxu1 %v158_v32 }
  0x45   :  { %385 = vmatmul.mubr.f32.vlgmr.msra.gmra.mxu0 %v65_v30  ;;  %416 = vmatpush3.msra.mxu1 %v158_v32 }
  0x46   :  { %417 = vmatprep.subr.mxu1 %v157_v33 }
  0x47   :  { %418 = vmatpush3.msra.mxu1 %v157_v33 }
 0x105   :  { %v386_v34 = vpop.f32.mrf.mxu0 }
 0x106   :  { %v174_v37 = vmul.f32 %v386_v34, %v386_v34 }
 0x107   :  { %v148_v35 = vpop.f32.mrf.mxu0 }
 0x108   :  { %v173_v36 = vmul.f32 %v148_v35, %v148_v35 }
 0x10a   :  { %419 = vmatprep.mubr.f32.mxu1 %v173_v36 }
 0x10b   :  { %420 = vmatmul.mubr.f32.vlgmr.msra.gmra.mxu1 %v174_v37 }
 0x1cb   :  { %v421_v39 = vpop.f32.mrf.mxu1 }
 0x1cd   :  { %v241_v40 = vpop.f32.mrf.mxu1 }
 0x1ce   :  { %250 = vmax.xlane.f32.xlu0 %v241_v40 }
 0x1d2   :  { %252 = vmax.xlane.f32.xlu0 %v421_v39 }
 0x257   :  { %v251_v44 = vpop.xlane.xlu0 %250 }
 0x258   :  { %vm257_vm2 = vcmp.eq.f32.partialorder %v241_v40, %v251_v44  ;;  %vm297_vm3 = vcmp.gt.f32.partialorder %v251_v44, %v295_v43 }
 0x259   :  { %v299_v45 = vsel %vm297_vm3, %v251_v44, %v295_v43  ;;  %vm259_vm4 = vmand %vm257_vm2, %vm256_vm1 }
 0x25a   :  { %302 = vst.msk [vmem:[#allocation2] sm:$0xff] %vm59_vm0, %v299_v45  ;;  %v261_v47 = vsel %vm259_vm4, %v255_v42, 2147483647 }
 0x25b   :  { %v253_v48 = vpop.xlane.xlu0 %252  ;;  %v264_v49 = vshra.s32 %v261_v47, 16  ;;  %v263_v56 = vand.u32 65535, %v261_v47 }
 0x25c   :  { %vm258_vm5 = vcmp.eq.f32.partialorder %v421_v39, %v253_v48  ;;  %vm298_vm6 = vcmp.gt.f32.partialorder %v253_v48, %v296_v46 }
 0x25d   :  { %v300_v50 = vsel %vm298_vm6, %v253_v48, %v296_v46  ;;  %v266_v51 = vcvt.s32.f32 %v264_v49  ;;  %vm260_vm7 = vmand %vm258_vm5, %vm256_vm1  ;;  %v265_v58 = vcvt.s32.f32 %v263_v56 }
 0x25e   :  { %303 = vst.msk [vmem:[#allocation2 + $0x8] sm:$0xff] %vm59_vm0, %v300_v50  ;;  %v262_v52 = vsel %vm260_vm7, %v255_v42, 2147483647 }
 0x25f   :  { %267 = vmin.xlane.f32.xlu1 %v266_v51  ;;  %v278_v53 = vshra.s32 %v262_v52, 16  ;;  %v277_v59 = vand.u32 65535, %v262_v52 }
 0x261   :  { %v280_v54 = vcvt.s32.f32 %v278_v53  ;;  %v279_v62 = vcvt.s32.f32 %v277_v59 }
 0x263   :  { %281 = vmin.xlane.f32.xlu1 %v280_v54 }
 0x2e8   :  { %v268_v57 = vpop.xlane.xlu1 %267 }
 0x2e9   :  { %vm269_vm8 = vcmp.eq.f32.partialorder %v266_v51, %v268_v57  ;;  %v274_v0 = vcvt.f32.s32 %v268_v57 }
 0x2ea   :  { %v270_v60 = vsel %vm269_vm8, %v265_v58, inf }
 0x2eb   :  { %271 = vmin.xlane.f32.xlu0 %v270_v60  ;;  %v275_v2 = vshll.u32 %v274_v0, 16 }
 0x2ec   :  { %v282_v61 = vpop.xlane.xlu1 %281 }
 0x2ed   :  { %vm283_vm9 = vcmp.eq.f32.partialorder %v280_v54, %v282_v61  ;;  %v288_v3 = vcvt.f32.s32 %v282_v61 }
 0x2ee   :  { %v284_v63 = vsel %vm283_vm9, %v279_v62, inf }
 0x2ef   :  { %285 = vmin.xlane.f32.xlu1 %v284_v63  ;;  %v289_v8 = vshll.u32 %v288_v3, 16 }
 0x374   :  { %v272_v1 = vpop.xlane.xlu0 %271 }
 0x375   :  { %v273_v4 = vcvt.f32.s32 %v272_v1 }
 0x377   :  { %v276_v6 = vadd.s32 %v275_v2, %v273_v4 }
 0x378   :  { %v286_v7 = vpop.xlane.xlu1 %285 }
 0x379   :  { %v306_v9 = vsel %vm297_vm3, %v276_v6, %v304_v5  ;;  %v287_v10 = vcvt.f32.s32 %v286_v7 }
 0x37a   :  { %308 = vst.msk [vmem:[%s564_s3] sm:$0xff] %vm59_vm0, %v306_v9 }
 0x37b   :  { %v290_v12 = vadd.s32 %v289_v8, %v287_v10 }
 0x37d   :  { %v307_v13 = vsel %vm298_vm6, %v290_v12, %v305_v11 }
 0x37e   :  { %309 = vst.msk [vmem:[%s564_s3 + $0x8] sm:$0xff] %vm59_vm0, %v307_v13 }
 0x37f   :  { %314 = vsyncpa [#allocation4], 1 }
 0x380   :  { %315 = vsyncpa [#allocation6], 1 }

</bundles_post_ra>
